<compile_context>
chip_gen: v5e
topology: v5e:2x2
jax: 0.10.0
libtpu: 0.0.40
codegen_flags: <defaults>
</compile_context>

<pallas_src>
import math

import jax
import jax.numpy as jnp
from jax.experimental import pallas as pl
from jax.experimental.pallas import tpu as pltpu


def _mm_tile_kernel(x1_ref, x2_ref, o_ref):
    # Recompute the (tiny) product in every invocation / grid step: it is a
    # single MXU op, and avoiding a VMEM scratch carry keeps the grid
    # embarrassingly parallel (both TensorCores on v7x can write disjoint
    # column slabs) and removes a scratch store+load round trip.
    prod = jnp.dot(
        x1_ref[...], x2_ref[...], preferred_element_type=jnp.float32
    )
    reps = o_ref.shape[1] // x2_ref.shape[1]
    # Single wide lane-dense store of all replicas in this slab.
    o_ref[...] = jnp.tile(prod, (1, reps)).astype(o_ref.dtype)


def model_forward(x1: jax.Array, x2: jax.Array, loop_var: int) -> jax.Array:
    assert loop_var >= 1, "loop_var must be >= 1 (torch.cat of empty list errors)"
    M, K = x1.shape
    K2, N = x2.shape
    assert K == K2

    itemsize = jnp.dtype(x1.dtype).itemsize
    full_out_bytes = M * N * loop_var * itemsize

    # --- Path 1: whole output fits comfortably in VMEM -> grid-less call. ---
    # No grid, no scratch, no pl.when: the entire replication collapses into
    # one matmul plus one full-extent (hence lane-dense) store.  This is the
    # path the 5x5 spec takes; it is launch-overhead bound, so fewer
    # instructions and no pipeline prologue is the only real lever.
    SINGLE_BLOCK_BUDGET = 1 << 20  # 1 MiB output slab (safe on v5e/v6e/v7x)

    if full_out_bytes <= SINGLE_BLOCK_BUDGET:
        return pl.pallas_call(
            _mm_tile_kernel,
            out_shape=jax.ShapeDtypeStruct((M, N * loop_var), x1.dtype),
        )(x1, x2)

    # --- Path 2: large loop_var -> 1-D parallel grid over column slabs. -----
    # Pick reps_per_step so that the output block's lane extent N*reps is a
    # multiple of 128 (unmasked vst stores; also satisfies the (8,128)
    # BlockSpec rule) while keeping the per-step slab at a few hundred KiB so
    # the default double-buffered pipeline hides the HBM writeback without
    # bloating VMEM.
    lane_base = 128 // math.gcd(N, 128)  # smallest reps with N*reps % 128 == 0
    target_slab_bytes = 512 * 1024
    reps = (target_slab_bytes // (M * N * itemsize)) // lane_base * lane_base
    reps = max(lane_base, reps)

    if reps >= loop_var:
        # One block covers the full extent anyway; use the grid-less path.
        return pl.pallas_call(
            _mm_tile_kernel,
            out_shape=jax.ShapeDtypeStruct((M, N * loop_var), x1.dtype),
        )(x1, x2)

    num_steps = pl.cdiv(loop_var, reps)  # last block may be partial (masked)

    # Explicit VMEM budget: 2x (double-buffered) out slab + 2x each input,
    # plus headroom.  Being explicit keeps pipeline depth at 2 on v7x
    # (64 MiB physical / 32 MiB scoped default) and on v5e (16 MiB scoped).
    vmem_need = 2 * (M * K + K * N + M * N * reps) * itemsize + (2 << 20)
    vmem_limit = int(min(max(vmem_need, 4 << 20), 64 << 20))

    return pl.pallas_call(
        _mm_tile_kernel,
        out_shape=jax.ShapeDtypeStruct((M, N * loop_var), x1.dtype),
        grid_spec=pltpu.PrefetchScalarGridSpec(
            num_scalar_prefetch=0,
            grid=(num_steps,),
            in_specs=[
                pl.BlockSpec((M, K), lambda i: (0, 0)),
                pl.BlockSpec((K, N), lambda i: (0, 0)),
            ],
            # Block start column = i * reps * N is always a multiple of N, so
            # the in-block jnp.tile lands each replica at the right offset.
            out_specs=pl.BlockSpec((M, N * reps), lambda i: (0, i)),
        ),
        compiler_params=pltpu.CompilerParams(
            # Each step recomputes the product -> steps are independent and
            # can be sharded across TensorCores (v7x) for the writeback.
            dimension_semantics=("parallel",),
            vmem_limit_bytes=vmem_limit,
        ),
    )(x1, x2)


if __name__ == "__main__":
    LOOP_VAR = 3  # positive iteration count (module default -1 would raise in torch)

    key = jax.random.PRNGKey(0)
    k1, k2 = jax.random.split(key)
    # Matches the reference script's x1 = torch.randn(5, 5), x2 = torch.randn(5, 5)
    x1 = jax.random.normal(k1, (5, 5), dtype=jnp.float32)
    x2 = jax.random.normal(k2, (5, 5), dtype=jnp.float32)

    out = model_forward(x1, x2, LOOP_VAR)
    out = jax.block_until_ready(out)

    # Correctness check against plain JAX reference.
    ref = jnp.concatenate([x1 @ x2] * LOOP_VAR, axis=1)
    assert out.shape == (5, 5 * LOOP_VAR), out.shape
    assert jnp.allclose(out, ref, atol=1e-5, rtol=1e-5)

    print("KERNEL_OK")
</pallas_src>

<mosaic_0001>
module attributes {stable_mosaic.version = 11 : i64} {
  func.func @_mm_tile_kernel(%arg0: memref<5x5xf32, #tpu.memory_space<vmem>>, %arg1: memref<5x5xf32, #tpu.memory_space<vmem>>, %arg2: memref<5x15xf32, #tpu.memory_space<vmem>>) attributes {dimension_semantics = [], scalar_prefetch = 0 : i64, scratch_operands = 0 : i64, tpu.core_type = #tpu.core_type<tc>} {
    %c0 = arith.constant 0 : index
    %c0_0 = arith.constant 0 : index
    %0 = vector.load %arg0[%c0, %c0_0] : memref<5x5xf32, #tpu.memory_space<vmem>>, vector<5x5xf32>
    %c0_1 = arith.constant 0 : index
    %c0_2 = arith.constant 0 : index
    %1 = vector.load %arg1[%c0_1, %c0_2] : memref<5x5xf32, #tpu.memory_space<vmem>>, vector<5x5xf32>
    %cst = arith.constant dense<0.000000e+00> : vector<5x5xf32>
    %2 = tpu.matmul %0, %1, %cst {dimension_numbers = #tpu.dot_dimension_numbers<[1], [0], [0], [1], [0, 0, 1, 1], [], []>} : vector<5x5xf32>, vector<5x5xf32>, vector<5x5xf32> -> vector<5x5xf32>
    %3 = tpu.concatenate %2, %2, %2 in 1 : vector<5x5xf32>, vector<5x5xf32>, vector<5x5xf32> -> vector<5x15xf32>
    %c0_3 = arith.constant 0 : index
    %c0_4 = arith.constant 0 : index
    %4 = vector.load %arg2[%c0_3, %c0_4] : memref<5x15xf32, #tpu.memory_space<vmem>>, vector<5x15xf32>
    tpu.vector_store %arg2[%c0_3, %c0_4], %3 {strides = array<i32>} : memref<5x15xf32, #tpu.memory_space<vmem>>, vector<5x15xf32>,
    return
  }
}

</mosaic_0001>

<bundles_post_ra>
// kernel: tpu_custom_call.1
= control target key start
LH: loop header
LB: loop body
LE: loop exit
PB: predicated region body
PF: predicated region fallthrough
CT: control target
= control target key end

     0   :  { %7 = vsyncpa [#allocation3], 0  ;;  %s216_s0 = inlined_call_operand.hbm [shape: f32[5,5], index: 0, kind: input, shape index: {}]   ;;  %s217_s1 = inlined_call_operand.hbm [shape: f32[5,5], index: 1, kind: input, shape index: {}]   ;;  %s218_s2 = inlined_call_operand.hbm [shape: f32[5,15], index: 2, kind: output, shape index: {}]  }
   0x1   :  { %8 = vsyncpa [#allocation6], 0 }
   0x2   :  { %9 = vsyncpa [#allocation4], 0  ;;  %s15_s11 = sshll.u32 %s216_s0, 4  ;;  %s185_s12 = smov [#allocation2]   ;;  %s16_s11 = int_to_ptr.hbm [resolvable:$true] %s15_s11 }
   0x3   :  { %s17_s13 = sshll.u32 %s185_s12, 4  ;;  %s26_s16 = sshll.u32 %s217_s1, 4  ;;  %s18_s13 = int_to_ptr.vmem [resolvable:$true] %s17_s13  ;;  %s27_s16 = int_to_ptr.hbm [resolvable:$true] %s26_s16 }
   0x4   :  { %20 = dma.hbm_to_vmem [thread:$0]  %s16_s11, 128, %s18_s13, [#allocation3]  }
   0x5   :  { %s186_s17 = smov [#allocation5]  }
   0x6   :  { %s28_s18 = sshll.u32 %s186_s17, 4  ;;  %s29_s18 = int_to_ptr.vmem [resolvable:$true] %s28_s18 }
   0x7   :  { %31 = dma.hbm_to_vmem [thread:$0]  %s27_s16, 128, %s29_s18, [#allocation6]  }
   0x8   :  { %179 = dma.done.wait [#allocation3], 128  }
   0x9   :  { %180 = vsyncadd [#allocation3], 4294967168 }
   0xa   :  { %181 = dma.done.wait [#allocation6], 128  }
   0xb   :  { %182 = vsyncadd [#allocation6], 4294967168  ;;  %vm46_vm0 = vcmask 1044480   ;;  %vm42_vm1 = vcmask 39936   ;;  %v41_v0 = vld [vmem:[#allocation5] sm:$0x1f] }
   0xc   :  { %v40_v1 = vld [vmem:[#allocation2] sm:$0x1f]  ;;  %100 = vmatpush.msk.msra.mxu0 %vm46_vm0, %v41_v0  ;;  %s187_s0 = smov 5   ;;  %s188_s1 = smov 10   ;;  %vm78_vm2 = vcmask 80896   ;;  %vm80_vm3 = vcmask 118784  }
   0xd   :  { %101 = vmatmul.msk.f32.vlgmr.msra.gmra.mxu0 %vm42_vm1, %v40_v1  ;;  %s189_s19 = smov [#allocation7]   ;;  %s89_s23 = sshll.u32 %s218_s2, 4  ;;  %s90_s23 = int_to_ptr.hbm [resolvable:$true] %s89_s23 }
   0xe   :  { %s87_s20 = sshll.u32 %s189_s19, 4  ;;  %s88_s20 = int_to_ptr.vmem [resolvable:$true] %s87_s20 }
  0x8a   :  { %v67_v2 = vpop.f32.mrf.mxu0 }
  0x8b   :  { %71 = vrot.lane.b32.xlu0 %v67_v2, %s187_s0 }
  0x93   :  { %74 = vrot.lane.b32.xlu0 %v67_v2, %s188_s1 }
  0xfd   :  { %v72_v3 = vpop.permute.xlu0 %71 }
  0xfe   :  { %v77_v4 = vsel %vm42_vm1, %v67_v2, %v72_v3 }
 0x105   :  { %v75_v5 = vpop.permute.xlu0 %74 }
 0x106   :  { %v79_v6 = vsel %vm78_vm2, %v77_v4, %v75_v5 }
 0x107   :  { %81 = vst.msk [vmem:[#allocation7] sm:$0x1f] %vm80_vm3, %v79_v6 }
 0x108   :  { %92 = dma.vmem_to_hbm [thread:$0]  %s88_s20, 128, %s90_s23, [#allocation4]  }
 0x109   :  { %183 = dma.done.wait [#allocation4], 128  }
 0x10a   :  { %184 = vsyncadd [#allocation4], 4294967168 }
 0x10b   :  { %97 = vsyncpa [#allocation3], 1 }
 0x10c   :  { %98 = vsyncpa [#allocation6], 1 }
 0x10d   :  { %99 = vsyncpa [#allocation4], 1 }

</bundles_post_ra>
